<compile_context>
chip_gen: v5e
topology: v5e:2x2
jax: 0.10.0
libtpu: 0.0.40
codegen_flags: <defaults>
</compile_context>

<pallas_src>
import functools

import jax
import jax.numpy as jnp
from jax import lax
from jax.experimental import pallas as pl
from jax.experimental.pallas import tpu as pltpu

N_EMBD = 16
DROPOUT_P = 0.5
LANES = 128
MAX_TILE_MF = 2048   # folded rows per grid step; 2048*128*4B = 1 MiB per tile buffer


def _ffwd_kernel(seed_ref, x_ref, w1_ref, b1_ref, w2_ref, b2_ref, o_ref, *,
                 training, p):
    # x tile: (tile_mf, 128) f32.  Weights: resident bf16 (128,128)
    # block-diagonal.  Biases: resident f32 (1,128).
    xb = x_ref[...].astype(jnp.bfloat16)

    # Linear 1 (pre-transposed, block-diagonal) + ReLU.  bf16 MXU, f32 accum.
    h = jnp.dot(xb, w1_ref[...], preferred_element_type=jnp.float32) + b1_ref[...]
    h = jnp.maximum(h, 0.0)

    # Linear 2.
    y = jnp.dot(h.astype(jnp.bfloat16), w2_ref[...],
                preferred_element_type=jnp.float32) + b2_ref[...]

    if training:
        # nn.Dropout(p): zero with prob p, scale survivors by 1/(1-p).
        # TODO(synk): stochastic op -- bit-exact parity with torch's RNG stream
        # is not possible; a counter-based integer hash of the global element
        # index gives iid Bernoulli(1-p) keeps, tiling-invariant and
        # interpret-mode safe (no pltpu.prng_*).
        tile_rows = y.shape[0]
        base = (pl.program_id(0) * tile_rows).astype(jnp.uint32)
        row = lax.broadcasted_iota(jnp.uint32, y.shape, 0) + base
        col = lax.broadcasted_iota(jnp.uint32, y.shape, 1)
        idx = (row << 7) | col                       # flat index: lane dim == 128
        z = idx + seed_ref[0].astype(jnp.uint32)
        # lowbias32-style integer mix (uint32, wrapping).
        z = (z ^ (z >> 16)) * jnp.uint32(0x7FEB352D)
        z = (z ^ (z >> 15)) * jnp.uint32(0x846CA68B)
        z = z ^ (z >> 16)
        # Integer-threshold compare on the low 31 bits (exact for p=0.5,
        # no u32->f32 convert).
        r = (z & jnp.uint32(0x7FFFFFFF)).astype(jnp.int32)
        threshold = jnp.int32(int(round(p * 2147483648.0)))   # p * 2^31
        keep = r >= threshold                                  # P(keep) = 1 - p
        y = jnp.where(keep, y * (1.0 / (1.0 - p)), 0.0)

    o_ref[...] = y.astype(o_ref.dtype)


def feedforward_pallas(x, w1, b1, w2, b2, *, training=False, seed=0):
    """x: (B, T, n_embd) f32; w1/w2: (out, in) PyTorch layout. Returns (B, T, n_embd) f32."""
    B, T, E = x.shape
    assert LANES % E == 0, "n_embd must divide 128 for the folded lane-dense layout"
    fold = LANES // E                    # original rows packed per folded row (8)
    M = B * T
    x2 = x.reshape(M, E)

    # Pad only to fold granularity (<= fold-1 rows, and usually not at all);
    # the ragged last *grid* block is handled by Pallas boundary masking, so
    # there is no full-size pad/slice HBM pass.
    m_pad = ((M + fold - 1) // fold) * fold
    if m_pad != M:
        x2 = jnp.pad(x2, ((0, m_pad - M), (0, 0)))
    mf = m_pad // fold
    xf = x2.reshape(mf, LANES)           # row-major fold: free view

    # Full dim if it fits, otherwise 2048 (multiple of 8); last block may be
    # partial -> Pallas masks its out-of-bounds rows.
    tile_mf = mf if mf <= MAX_TILE_MF else MAX_TILE_MF
    grid_m = pl.cdiv(mf, tile_mf)

    if training:
        # Guard the 32-bit counter space of the dropout hash.
        assert mf * LANES < 2 ** 32, "dropout element index would wrap uint32"

    # One-time wrapper-side weight prep: pre-transpose + block-diagonalize,
    # cast to bf16 for single-pass MXU (f32 accumulation in-kernel).
    eye = jnp.eye(fold, dtype=jnp.float32)
    w1_bd = jnp.kron(eye, w1.T).astype(jnp.bfloat16)            # (128, 128) bf16
    w2_bd = jnp.kron(eye, w2.T).astype(jnp.bfloat16)            # (128, 128) bf16
    b1_bd = jnp.tile(b1, fold)[None, :].astype(jnp.float32)     # (1, 128) f32
    b2_bd = jnp.tile(b2, fold)[None, :].astype(jnp.float32)     # (1, 128) f32

    seed_arr = jnp.array([seed], dtype=jnp.int32)
    kernel = functools.partial(_ffwd_kernel, training=training, p=DROPOUT_P)

    flops = 2 * 2 * M * E * E            # two (M,E)x(E,E) matmuls (useful flops)
    bytes_accessed = (2 * mf * LANES * 4                 # x in + out, f32
                      + (w1_bd.size + w2_bd.size) * 2    # bf16 weights
                      + 2 * LANES * 4)                   # biases

    out = pl.pallas_call(
        kernel,
        out_shape=jax.ShapeDtypeStruct((mf, LANES), x.dtype),
        grid=(grid_m,),
        in_specs=[
            pl.BlockSpec(memory_space=pltpu.MemorySpace.SMEM),   # seed scalar
            pl.BlockSpec((tile_mf, LANES), lambda i: (i, 0)),    # x (pipelined over M)
            pl.BlockSpec((LANES, LANES), lambda i: (0, 0)),      # w1 (resident)
            pl.BlockSpec((1, LANES), lambda i: (0, 0)),          # b1 (resident)
            pl.BlockSpec((LANES, LANES), lambda i: (0, 0)),      # w2 (resident)
            pl.BlockSpec((1, LANES), lambda i: (0, 0)),          # b2 (resident)
        ],
        out_specs=pl.BlockSpec((tile_mf, LANES), lambda i: (i, 0)),
        compiler_params=pltpu.CompilerParams(
            dimension_semantics=("parallel",)),                  # megacore on v7x
        cost_estimate=pl.CostEstimate(
            flops=flops, transcendentals=0, bytes_accessed=bytes_accessed),
    )(seed_arr, xf, w1_bd, b1_bd, w2_bd, b2_bd)

    y = out.reshape(m_pad, E)
    if m_pad != M:                       # only when B*T isn't a multiple of 8
        y = y[:M]
    return y.reshape(B, T, E)


def _init_linear(key, fan_in, fan_out):
    # Mirrors torch.nn.Linear default init: U(-1/sqrt(fan_in), 1/sqrt(fan_in))
    kw, kb = jax.random.split(key)
    bound = 1.0 / jnp.sqrt(float(fan_in))
    w = jax.random.uniform(kw, (fan_out, fan_in), jnp.float32, -bound, bound)
    b = jax.random.uniform(kb, (fan_out,), jnp.float32, -bound, bound)
    return w, b


if __name__ == "__main__":
    key = jax.random.PRNGKey(0)
    kx, k1, k2 = jax.random.split(key, 3)

    B, T = 2, 8
    x = jax.random.normal(kx, (B, T, N_EMBD), dtype=jnp.float32)

    w1, b1 = _init_linear(k1, N_EMBD, N_EMBD)
    w2, b2 = _init_linear(k2, N_EMBD, N_EMBD)

    # Eval-mode forward (Dropout = identity), matching module.eval() semantics.
    y = jax.block_until_ready(feedforward_pallas(x, w1, b1, w2, b2, training=False))

    # Reference matching the in-kernel compute path (bf16 MXU, f32 accumulate).
    xb = x.astype(jnp.bfloat16)
    h_ref = jnp.maximum(
        jnp.dot(xb, w1.T.astype(jnp.bfloat16),
                preferred_element_type=jnp.float32) + b1, 0.0)
    y_ref = jnp.dot(h_ref.astype(jnp.bfloat16), w2.T.astype(jnp.bfloat16),
                    preferred_element_type=jnp.float32) + b2
    assert jnp.allclose(y, y_ref, atol=1e-3, rtol=1e-3), "mismatch vs bf16 reference"

    # Sanity vs pure-f32 math (loose tolerance: bf16 mantissa rounding).
    y_f32 = jnp.maximum(x @ w1.T + b1, 0.0) @ w2.T + b2
    assert jnp.allclose(y, y_f32, atol=1e-1, rtol=1e-1), "far from f32 reference"

    # Training-mode path (in-kernel dropout): each element is either 0 or the
    # eval value scaled by 1/(1-p).
    y_tr = jax.block_until_ready(
        feedforward_pallas(x, w1, b1, w2, b2, training=True, seed=42))
    assert y_tr.shape == y.shape
    scaled = y_ref * (1.0 / (1.0 - DROPOUT_P))
    ok = (y_tr == 0) | (jnp.abs(y_tr - scaled) < 1e-2)
    assert bool(jnp.all(ok)), "dropout survivors not scaled correctly"
    frac_zero = float(jnp.mean((y_tr == 0).astype(jnp.float32)))
    assert 0.2 < frac_zero < 0.8, "dropout keep rate far from 1-p"

    print("KERNEL_OK")
</pallas_src>

<mosaic_0001>
module attributes {stable_mosaic.version = 11 : i64} {
  func.func @_ffwd_kernel(%arg0: i32, %arg1: memref<1xi32, #tpu.memory_space<smem>>, %arg2: memref<2x128xf32, #tpu.memory_space<vmem>>, %arg3: memref<128x128xbf16, #tpu.memory_space<vmem>>, %arg4: memref<1x128xf32, #tpu.memory_space<vmem>>, %arg5: memref<128x128xbf16, #tpu.memory_space<vmem>>, %arg6: memref<1x128xf32, #tpu.memory_space<vmem>>, %arg7: memref<2x128xf32, #tpu.memory_space<vmem>>) attributes {dimension_semantics = [#tpu.dimension_semantics<parallel>], iteration_bounds = array<i64: 1>, scalar_prefetch = 0 : i64, scratch_operands = 0 : i64, tpu.core_type = #tpu.core_type<tc>, window_params = [{transform_indices = @transform_0, window_bounds = array<i64: 1>}, {transform_indices = @transform_1, window_bounds = array<i64: 2, 128>}, {pipeline_mode = #tpu.pipeline_mode<synchronous>, transform_indices = @transform_2, window_bounds = array<i64: 128, 128>}, {pipeline_mode = #tpu.pipeline_mode<synchronous>, transform_indices = @transform_3, window_bounds = array<i64: 1, 128>}, {pipeline_mode = #tpu.pipeline_mode<synchronous>, transform_indices = @transform_4, window_bounds = array<i64: 128, 128>}, {pipeline_mode = #tpu.pipeline_mode<synchronous>, transform_indices = @transform_5, window_bounds = array<i64: 1, 128>}, {transform_indices = @transform_6, window_bounds = array<i64: 2, 128>}]} {
    %c0 = arith.constant 0 : index
    %c0_0 = arith.constant 0 : index
    %0 = vector.load %arg2[%c0, %c0_0] : memref<2x128xf32, #tpu.memory_space<vmem>>, vector<2x128xf32>
    %1 = arith.truncf %0 : vector<2x128xf32> to vector<2x128xbf16>
    %c0_1 = arith.constant 0 : index
    %c0_2 = arith.constant 0 : index
    %2 = vector.load %arg3[%c0_1, %c0_2] : memref<128x128xbf16, #tpu.memory_space<vmem>>, vector<128x128xbf16>
    %cst = arith.constant dense<0.000000e+00> : vector<2x128xf32>
    %3 = tpu.matmul %1, %2, %cst {dimension_numbers = #tpu.dot_dimension_numbers<[1], [0], [0], [1], [0, 0, 1, 1], [], []>} : vector<2x128xbf16>, vector<128x128xbf16>, vector<2x128xf32> -> vector<2x128xf32>
    %c0_3 = arith.constant 0 : index
    %c0_4 = arith.constant 0 : index
    %4 = vector.load %arg4[%c0_3, %c0_4] : memref<1x128xf32, #tpu.memory_space<vmem>>, vector<1x128xf32>
    %5 = vector.broadcast %4 : vector<1x128xf32> to vector<2x128xf32>
    %6 = arith.addf %3, %5 : vector<2x128xf32>
    %cst_5 = arith.constant 0.000000e+00 : f32
    %7 = vector.broadcast %cst_5 : f32 to vector<2x128xf32>
    %8 = arith.maximumf %6, %7 : vector<2x128xf32>
    %9 = arith.truncf %8 : vector<2x128xf32> to vector<2x128xbf16>
    %c0_6 = arith.constant 0 : index
    %c0_7 = arith.constant 0 : index
    %10 = vector.load %arg5[%c0_6, %c0_7] : memref<128x128xbf16, #tpu.memory_space<vmem>>, vector<128x128xbf16>
    %cst_8 = arith.constant dense<0.000000e+00> : vector<2x128xf32>
    %11 = tpu.matmul %9, %10, %cst_8 {dimension_numbers = #tpu.dot_dimension_numbers<[1], [0], [0], [1], [0, 0, 1, 1], [], []>} : vector<2x128xbf16>, vector<128x128xbf16>, vector<2x128xf32> -> vector<2x128xf32>
    %c0_9 = arith.constant 0 : index
    %c0_10 = arith.constant 0 : index
    %12 = vector.load %arg6[%c0_9, %c0_10] : memref<1x128xf32, #tpu.memory_space<vmem>>, vector<1x128xf32>
    %13 = vector.broadcast %12 : vector<1x128xf32> to vector<2x128xf32>
    %14 = arith.addf %11, %13 : vector<2x128xf32>
    %c0_11 = arith.constant 0 : index
    %c0_12 = arith.constant 0 : index
    %15 = vector.load %arg7[%c0_11, %c0_12] : memref<2x128xf32, #tpu.memory_space<vmem>>, vector<2x128xf32>
    tpu.vector_store %arg7[%c0_11, %c0_12], %14 {strides = array<i32>} : memref<2x128xf32, #tpu.memory_space<vmem>>, vector<2x128xf32>,
    return
  }
  func.func @transform_0(%arg0: i32) -> i32 {
    %c0_i32 = arith.constant 0 : i32
    %c0_i32_0 = arith.constant 0 : i32
    return %c0_i32 : i32
  }
  func.func @transform_1(%arg0: i32) -> (i32, i32) {
    %c0_i32 = arith.constant 0 : i32
    %c0_i32_0 = arith.constant 0 : i32
    return %arg0, %c0_i32 : i32, i32
  }
  func.func @transform_2(%arg0: i32) -> (i32, i32) {
    %c0_i32 = arith.constant 0 : i32
    %c0_i32_0 = arith.constant 0 : i32
    %c0_i32_1 = arith.constant 0 : i32
    return %c0_i32, %c0_i32_0 : i32, i32
  }
  func.func @transform_3(%arg0: i32) -> (i32, i32) {
    %c0_i32 = arith.constant 0 : i32
    %c0_i32_0 = arith.constant 0 : i32
    %c0_i32_1 = arith.constant 0 : i32
    return %c0_i32, %c0_i32_0 : i32, i32
  }
  func.func @transform_4(%arg0: i32) -> (i32, i32) {
    %c0_i32 = arith.constant 0 : i32
    %c0_i32_0 = arith.constant 0 : i32
    %c0_i32_1 = arith.constant 0 : i32
    return %c0_i32, %c0_i32_0 : i32, i32
  }
  func.func @transform_5(%arg0: i32) -> (i32, i32) {
    %c0_i32 = arith.constant 0 : i32
    %c0_i32_0 = arith.constant 0 : i32
    %c0_i32_1 = arith.constant 0 : i32
    return %c0_i32, %c0_i32_0 : i32, i32
  }
  func.func @transform_6(%arg0: i32) -> (i32, i32) {
    %c0_i32 = arith.constant 0 : i32
    %c0_i32_0 = arith.constant 0 : i32
    return %arg0, %c0_i32 : i32, i32
  }
}

</mosaic_0001>

<bundles_post_ra>
// kernel: tpu_custom_call.1
= control target key start
LH: loop header
LB: loop body
LE: loop exit
PB: predicated region body
PF: predicated region fallthrough
CT: control target
= control target key end

     0   :  { %12 = vsyncpa [#allocation4], 0  ;;  %s465_s0 = inlined_call_operand.<no memory space> [shape: s32[1], index: 0, kind: input, shape index: {}]   ;;  %s466_s1 = inlined_call_operand.vmem [shape: f32[2,128], index: 1, kind: input, shape index: {}]   ;;  %s467_s2 = inlined_call_operand.hbm [shape: bf16[128,128], index: 2, kind: input, shape index: {}]   ;;  %s468_s3 = inlined_call_operand.vmem [shape: f32[1,128], index: 3, kind: input, shape index: {}]   ;;  %s469_s4 = inlined_call_operand.hbm [shape: bf16[128,128], index: 4, kind: input, shape index: {}]   ;;  %s470_s5 = inlined_call_operand.vmem [shape: f32[1,128], index: 5, kind: input, shape index: {}]   ;;  %s471_s6 = inlined_call_operand.hbm [shape: f32[2,128], index: 6, kind: output, shape index: {}]  }
   0x1   :  { %13 = vsyncpa [#allocation7], 0 }
   0x2   :  { %14 = vsyncpa [#allocation5], 0  ;;  %s23_s22 = sshll.u32 %s467_s2, 4  ;;  %s407_s23 = smov [#allocation3]   ;;  %s24_s22 = int_to_ptr.hbm [resolvable:$true] %s23_s22 }
   0x3   :  { %s25_s24 = sshll.u32 %s407_s23, 4  ;;  %s38_s27 = sshll.u32 %s469_s4, 4  ;;  %s26_s24 = int_to_ptr.vmem [resolvable:$true] %s25_s24  ;;  %s39_s27 = int_to_ptr.hbm [resolvable:$true] %s38_s27 }
   0x4   :  { %s408_s28 = smov 64   ;;  %s409_s29 = smov 4  }
   0x5   :  { %31 = dma.hbm_to_vmem [thread:$0]  %s24_s22, 1024, %s26_s24, [#allocation4], %s408_s28, %s408_s28, %s409_s29  }
   0x6   :  { %s410_s30 = smov [#allocation6]  }
   0x7   :  { %s40_s7 = sshll.u32 %s410_s30, 4  ;;  %s41_s7 = int_to_ptr.vmem [resolvable:$true] %s40_s7 }
   0x8   :  { %46 = dma.hbm_to_vmem [thread:$0]  %s39_s27, 1024, %s41_s7, [#allocation7], %s408_s28, %s408_s28, %s409_s29  }
   0x9   :  { %401 = dma.done.wait [#allocation4], 1024  }
   0xa   :  { %402 = vsyncadd [#allocation4], 4294966272 }
   0xb   :  { %403 = dma.done.wait [#allocation7], 1024  }
   0xc   :  { %404 = vsyncadd [#allocation7], 4294966272  ;;  %v313_v0 = vld [vmem:[#allocation3 + $0x38] sm:$0xff]  ;;  %v312_v1 = vld [vmem:[#allocation3 + $0x30] sm:$0xff]  ;;  %s231_s15 = sshll.u32 %s471_s6, 4  ;;  %s232_s15 = int_to_ptr.hbm [resolvable:$true] %s231_s15 }
   0xd   :  { %127 = vmatpush.bf16.msra.mxu0 %v313_v0  ;;  %v321_v2 = vld [vmem:[#allocation6 + $0x38] sm:$0xff]  ;;  %v320_v3 = vld [vmem:[#allocation6 + $0x30] sm:$0xff]  ;;  %v311_v4 = vld [vmem:[#allocation3 + $0x28] sm:$0xff] }
   0xe   :  { %210 = vmatpush.bf16.msra.mxu1 %v321_v2  ;;  %v319_v5 = vld [vmem:[#allocation6 + $0x28] sm:$0xff]  ;;  %v310_v6 = vld [vmem:[#allocation3 + $0x20] sm:$0xff]  ;;  %v309_v8 = vld [vmem:[#allocation3 + $0x18] sm:$0xff] }
   0xf   :  { %v318_v7 = vld [vmem:[#allocation6 + $0x20] sm:$0xff]  ;;  %v317_v9 = vld [vmem:[#allocation6 + $0x18] sm:$0xff]  ;;  %v308_v10 = vld [vmem:[#allocation3 + $0x10] sm:$0xff] }
  0x10   :  { %v316_v11 = vld [vmem:[#allocation6 + $0x10] sm:$0xff]  ;;  %v307_v12 = vld [vmem:[#allocation3 + $0x8] sm:$0xff]  ;;  %v306_v13 = vld [vmem:[#allocation3] sm:$0xff] }
  0x11   :  { %128 = vmatpush.bf16.msra.mxu0 %v312_v1  ;;  %v57_v14 = vld [vmem:[%s466_s1] sm:$0x3]  ;;  %v315_v16 = vld [vmem:[#allocation6 + $0x8] sm:$0xff]  ;;  %s411_s1 = smov [#allocation8]  }
  0x12   :  { %211 = vmatpush.bf16.msra.mxu1 %v320_v3  ;;  %v58_v15 = vpack.c.bf16 %v57_v14, %v57_v14  ;;  %v314_v17 = vld [vmem:[#allocation6] sm:$0xff]  ;;  %s229_s12 = sshll.u32 %s411_s1, 4  ;;  %s230_s12 = int_to_ptr.vmem [resolvable:$true] %s229_s12 }
  0x13   :  { %v327_v18 = vld [vmem:[%s468_s3] ss:$0 sm:$0xff] }
  0x14   :  { %v328_v24 = vld [vmem:[%s470_s5] ss:$0 sm:$0xff] }
  0x15   :  { %129 = vmatpush.bf16.msra.mxu0 %v311_v4 }
  0x16   :  { %212 = vmatpush.bf16.msra.mxu1 %v319_v5 }
  0x19   :  { %130 = vmatpush.bf16.msra.mxu0 %v310_v6 }
  0x1a   :  { %213 = vmatpush.bf16.msra.mxu1 %v318_v7 }
  0x1d   :  { %131 = vmatpush.bf16.msra.mxu0 %v309_v8 }
  0x1e   :  { %214 = vmatpush.bf16.msra.mxu1 %v317_v9 }
  0x21   :  { %132 = vmatpush.bf16.msra.mxu0 %v308_v10 }
  0x22   :  { %215 = vmatpush.bf16.msra.mxu1 %v316_v11 }
  0x25   :  { %133 = vmatpush.bf16.msra.mxu0 %v307_v12 }
  0x26   :  { %216 = vmatpush.bf16.msra.mxu1 %v315_v16 }
  0x29   :  { %134 = vmatpush.bf16.msra.mxu0 %v306_v13 }
  0x2a   :  { %217 = vmatpush.bf16.msra.mxu1 %v314_v17 }
  0x2c   :  { %135 = vmatmul.bf16.vlgmr.msra.gmra.mxu0 %v58_v15 }
  0xa9   :  { %v136_v19 = vpop.f32.mrf.mxu0 }
  0xaa   :  { %v137_v20 = vadd.f32 %v327_v18, %v136_v19 }
  0xac   :  { %v140_v21 = vmax.f32 %v137_v20, 0.0 }
  0xae   :  { %v141_v22 = vpack.c.bf16 %v140_v21, %v140_v21 }
  0xb0   :  { %218 = vmatmul.bf16.vlgmr.msra.gmra.mxu1 %v141_v22 }
  0xb1   :  { %v138_v23 = vpop.f32.mrf.mxu0 }
 0x12d   :  { %v219_v25 = vpop.f32.mrf.mxu1 }
 0x12e   :  { %v220_v26 = vadd.f32 %v328_v24, %v219_v25 }
 0x130   :  { %223 = vst [vmem:[#allocation8] sm:$0x3] %v220_v26 }
 0x131   :  { %234 = dma.vmem_to_hbm [thread:$0]  %s230_s12, 32, %s232_s15, [#allocation5]  }
 0x135   :  { %v221_v27 = vpop.f32.mrf.mxu1 }
 0x136   :  { %405 = dma.done.wait [#allocation5], 32  }
 0x137   :  { %406 = vsyncadd [#allocation5], 4294967264 }
 0x138   :  { %239 = vsyncpa [#allocation4], 1 }
 0x139   :  { %240 = vsyncpa [#allocation7], 1 }
 0x13a   :  { %241 = vsyncpa [#allocation5], 1 }

</bundles_post_ra>
